<compile_context>
chip_gen: v7x
topology: tpu7x:2x2x1
jax: 0.10.0
libtpu: 0.0.40
codegen_flags: <defaults>
</compile_context>

<pallas_src>
import jax
import jax.numpy as jnp
from jax.experimental import pallas as pl
from jax.experimental.pallas import tpu as pltpu

_LANE = 128


def _relu2_kernel(x_ref, o_ref):
    x = x_ref[...]
    if jnp.issubdtype(x.dtype, jnp.floating):
        x = x.astype(jnp.float32)  # exact for relu; single rounding on the cast back
    r = jnp.maximum(x, 0)
    o_ref[...] = (r * r).astype(o_ref.dtype)


def _sublane_multiple(dtype) -> int:
    itemsize = jnp.dtype(dtype).itemsize
    return {4: 8, 2: 16, 1: 32}.get(itemsize, 8)


def _chip_params():
    """Generation-aware block-size / VMEM-limit choices (conservative fallback)."""
    kind = ""
    try:
        kind = jax.devices()[0].device_kind.lower()
    except Exception:
        pass
    if "7" in kind:  # v7x: ~3.2 TB/s HBM, 2 TensorCores, 64 MiB VMEM
        return {"block_bytes": 8 << 20, "vmem_limit": 48 << 20, "two_core": True}
    if "v6" in kind or "6e" in kind:  # v6e: 32 MiB scoped-VMEM default
        return {"block_bytes": 4 << 20, "vmem_limit": None, "two_core": False}
    # v5e / unknown: 2 MiB blocks fit the 16 MiB scoped-VMEM default.
    return {"block_bytes": 2 << 20, "vmem_limit": None, "two_core": False}


def relu2(x: jax.Array) -> jax.Array:
    """Elementwise relu(x)**2 via a Pallas TPU kernel. Works for any shape/dtype."""
    orig_shape = x.shape
    dtype = x.dtype
    n = x.size
    if n == 0:
        return x

    params = _chip_params()
    block_bytes = params["block_bytes"]
    itemsize = jnp.dtype(dtype).itemsize
    sub = _sublane_multiple(dtype)

    flat = x.reshape(-1)
    compiler_params = pltpu.CompilerParams(
        dimension_semantics=("parallel",),
        vmem_limit_bytes=params["vmem_limit"],
    )

    if n % _LANE == 0:
        # Fast path: lane-dense 2-D view with a wide lane width that divides n.
        lane_width = _LANE
        for cand in (4096, 2048, 1024, 512, 256):
            if n % cand == 0:
                lane_width = cand
                break
        rows = n // lane_width
        x2d = flat.reshape(rows, lane_width)

        # Row tile targeting the per-generation block size, sublane-aligned.
        tile_rows = (block_bytes // (lane_width * itemsize)) // sub * sub
        tile_rows = max(sub, tile_rows)
        if tile_rows >= rows:
            if params["two_core"] and rows >= 2 * sub:
                # v7x: keep >= 2 parallel grid steps so both TensorCores stream.
                tile_rows = pl.cdiv(pl.cdiv(rows, 2), sub) * sub
            else:
                tile_rows = rows  # single full-extent block (always legal)
        grid = (pl.cdiv(rows, tile_rows),)  # ragged final block masked by Pallas

        out2d = pl.pallas_call(
            _relu2_kernel,
            out_shape=jax.ShapeDtypeStruct((rows, lane_width), dtype),
            grid_spec=pltpu.PrefetchScalarGridSpec(
                num_scalar_prefetch=0,
                grid=grid,
                in_specs=[pl.BlockSpec((tile_rows, lane_width), lambda i: (i, 0))],
                out_specs=pl.BlockSpec((tile_rows, lane_width), lambda i: (i, 0)),
            ),
            compiler_params=compiler_params,
        )(x2d)
        return out2d.reshape(orig_shape)

    # Ragged element count: 1-D view, cdiv grid, masked final block.
    # No pad, no output slice -> exactly one HBM read + one HBM write.
    chunk = sub * _LANE
    tile = max(chunk, (block_bytes // itemsize) // chunk * chunk)
    if tile >= n:
        tile = n  # full-extent 1-D block: legal for any n
        grid = (1,)
    else:
        grid = (pl.cdiv(n, tile),)

    out_flat = pl.pallas_call(
        _relu2_kernel,
        out_shape=jax.ShapeDtypeStruct((n,), dtype),
        grid_spec=pltpu.PrefetchScalarGridSpec(
            num_scalar_prefetch=0,
            grid=grid,
            in_specs=[pl.BlockSpec((tile,), lambda i: (i,))],
            out_specs=pl.BlockSpec((tile,), lambda i: (i,)),
        ),
        compiler_params=compiler_params,
    )(flat)
    return out_flat.reshape(orig_shape)


if __name__ == "__main__":
    key = jax.random.PRNGKey(0)
    k1, k2, k3 = jax.random.split(key, 3)

    # NCHW activations: batch=2, channels=4, 16x16 (fast lane-dense 2-D path).
    x = jax.random.normal(key, (2, 4, 16, 16), dtype=jnp.float32)
    y = jax.block_until_ready(relu2(x))
    ref = jnp.maximum(x, 0.0) ** 2
    assert y.shape == x.shape and y.dtype == x.dtype
    assert jnp.allclose(y, ref, atol=1e-6, rtol=1e-6)

    # Ragged size (exercises the no-pad 1-D masked-block path).
    xr = jax.random.normal(k1, (3, 5, 7), dtype=jnp.float32)
    yr = jax.block_until_ready(relu2(xr))
    refr = jnp.maximum(xr, 0.0) ** 2
    assert yr.shape == xr.shape and jnp.allclose(yr, refr, atol=1e-6, rtol=1e-6)

    # bf16 activations (16-sublane alignment; f32 compute inside the kernel).
    xb = jax.random.normal(k2, (2, 4, 16, 16), dtype=jnp.bfloat16)
    yb = jax.block_until_ready(relu2(xb))
    refb = jnp.square(jnp.maximum(xb.astype(jnp.float32), 0.0))
    assert yb.dtype == xb.dtype
    assert jnp.allclose(yb.astype(jnp.float32), refb, atol=1e-2, rtol=1e-2)

    # Moderately larger case to exercise a multi-step parallel grid.
    xg = jax.random.normal(k3, (512, 2048), dtype=jnp.float32)
    yg = jax.block_until_ready(relu2(xg))
    refg = jnp.maximum(xg, 0.0) ** 2
    assert jnp.allclose(yg, refg, atol=1e-6, rtol=1e-6)

    print("KERNEL_OK")
</pallas_src>

<mosaic_0001>
module attributes {stable_mosaic.version = 11 : i64} {
  func.func @_relu2_kernel(%arg0: i32, %arg1: memref<1x2048xf32, #tpu.memory_space<vmem>>, %arg2: memref<1x2048xf32, #tpu.memory_space<vmem>>) attributes {dimension_semantics = [#tpu.dimension_semantics<parallel>], iteration_bounds = array<i64: 1>, scalar_prefetch = 0 : i64, scratch_operands = 0 : i64, tpu.core_type = #tpu.core_type<tc>, window_params = [{transform_indices = @transform_0, window_bounds = array<i64: 1, 2048>}, {transform_indices = @transform_1, window_bounds = array<i64: 1, 2048>}]} {
    %c0 = arith.constant 0 : index
    %c0_0 = arith.constant 0 : index
    %0 = vector.load %arg1[%c0, %c0_0] : memref<1x2048xf32, #tpu.memory_space<vmem>>, vector<1x2048xf32>
    %cst = arith.constant 0.000000e+00 : f32
    %1 = vector.broadcast %cst : f32 to vector<1x2048xf32>
    %2 = arith.maximumf %0, %1 : vector<1x2048xf32>
    %3 = arith.mulf %2, %2 : vector<1x2048xf32>
    %c0_1 = arith.constant 0 : index
    %c0_2 = arith.constant 0 : index
    %4 = vector.load %arg2[%c0_1, %c0_2] : memref<1x2048xf32, #tpu.memory_space<vmem>>, vector<1x2048xf32>
    tpu.vector_store %arg2[%c0_1, %c0_2], %3 {strides = array<i32>} : memref<1x2048xf32, #tpu.memory_space<vmem>>, vector<1x2048xf32>,
    return
  }
  func.func @transform_0(%arg0: i32) -> (i32, i32) {
    %c0_i32 = arith.constant 0 : i32
    %c0_i32_0 = arith.constant 0 : i32
    return %arg0, %c0_i32 : i32, i32
  }
  func.func @transform_1(%arg0: i32) -> (i32, i32) {
    %c0_i32 = arith.constant 0 : i32
    %c0_i32_0 = arith.constant 0 : i32
    return %arg0, %c0_i32 : i32, i32
  }
}

</mosaic_0001>

<bundles_post_ra>
// kernel: tpu_custom_call.1
= control target key start
LH: loop header
LB: loop body
LE: loop exit
PB: predicated region body
PF: predicated region fallthrough
CT: control target
= control target key end

     0   :  { %6 = vsyncpa [#allocation3], 0  ;;  %s130_s0 = inlined_call_operand.hbm [shape: f32[1,2048], index: 0, kind: input, shape index: {}]   ;;  %s131_s1 = inlined_call_operand.hbm [shape: f32[1,2048], index: 1, kind: output, shape index: {}]  }
   0x1   :  { %7 = vsyncpa [#allocation4], 0  ;;  %s94_s6 = smov [#allocation2]   ;;  %s46_s10 = scalar_lea.hbm %s130_s0, 256 }
   0x2   :  { %s14_s7 = sshll.u32 %s94_s6, 4  ;;  %p47_p0 = scmp.ne.s32.totalorder %s130_s0, %s46_s10  ;;  %s15_s7 = int_to_ptr.vmem [resolvable:$true] %s14_s7 }
   0x3   :  { %p50_p1 = scmp.lt.u32.totalorder %s46_s10, %s130_s0 }
   0x5   :  { %p52_p2 = pnand %p50_p1, %p47_p0 }
   0x7   :  { %55 = shalt.err (!%p52_p2)
}
   0x8   :  { %s56_s15 = scalar_lea.vmem %s15_s7, 256  ;;  %p61_p4 = scmp.lt.s32.totalorder %s15_s7, %s15_s7 }
   0x9   :  { %p57_p3 = scmp.ne.s32.totalorder %s15_s7, %s56_s15  ;;  %p62_p5 = scmp.lt.s32.totalorder %s56_s15, %s56_s15 }
   0xb   :  { %p63_p6 = por %p62_p5, %p61_p4 }
   0xd   :  { %p64_p7 = pnand %p63_p6, %p57_p3 }
   0xf   :  { %67 = shalt.err (!%p64_p7)
}
  0x10   :  { %17 = dma.hbm_to_vmem [thread:$0]  %s130_s0, 256, %s15_s7, [#allocation3]  }
  0x11   :  { %90 = dma.done.wait [#allocation3], 256  }
  0x12   :  { %91 = vsyncadd [#allocation3], 4294967040  ;;  %v21_v0 = vld [vmem:[#allocation2] sm:$0xff]  ;;  %v22_v1 = vld [vmem:[#allocation2 + $0x8] sm:$0xff]  ;;  %s95_s18 = smov [#allocation5]  }
  0x13   :  { %s35_s19 = sshll.u32 %s95_s18, 4  ;;  %v23_v2 = vmax.f32 %v21_v0, 0.0  ;;  %v24_v3 = vmax.f32 %v22_v1, 0.0  ;;  %s36_s19 = int_to_ptr.vmem [resolvable:$true] %s35_s19 }
  0x14   :  { %s68_s20 = scalar_lea.vmem %s36_s19, 256  ;;  %p73_p9 = scmp.lt.s32.totalorder %s36_s19, %s36_s19 }
  0x15   :  { %v25_v4 = vmul.f32 %v23_v2, %v23_v2  ;;  %v26_v5 = vmul.f32 %v24_v3, %v24_v3  ;;  %p69_p8 = scmp.ne.s32.totalorder %s36_s19, %s68_s20  ;;  %p74_p10 = scmp.lt.s32.totalorder %s68_s20, %s68_s20 }
  0x17   :  { %27 = vst [vmem:[#allocation5] sm:$0xff] %v25_v4  ;;  %28 = vst [vmem:[#allocation5 + $0x8] sm:$0xff] %v26_v5  ;;  %p75_p11 = por %p74_p10, %p73_p9 }
  0x19   :  { %p76_p12 = pnand %p75_p11, %p69_p8 }
  0x1b   :  { %79 = shalt.err (!%p76_p12)
}
  0x1c   :  { %s80_s22 = scalar_lea.hbm %s131_s1, 256 }
  0x1d   :  { %p81_p13 = scmp.ne.s32.totalorder %s131_s1, %s80_s22  ;;  %p84_p0 = scmp.lt.u32.totalorder %s80_s22, %s131_s1 }
  0x1f   :  { %p86_p1 = pnand %p84_p0, %p81_p13 }
  0x21   :  { %89 = shalt.err (!%p86_p1)
}
  0x22   :  { %38 = dma.vmem_to_hbm [thread:$0]  %s36_s19, 256, %s131_s1, [#allocation4]  }
  0x23   :  { %92 = dma.done.wait [#allocation4], 256  }
  0x24   :  { %93 = vsyncadd [#allocation4], 4294967040 }
  0x25   :  { %42 = vsyncpa [#allocation3], 1 }
  0x26   :  { %43 = vsyncpa [#allocation4], 1 }

</bundles_post_ra>
